<compile_context>
chip_gen: v6e
topology: v6e:2x2x1
jax: 0.10.0
libtpu: 0.0.40
codegen_flags: <defaults>
</compile_context>

<pallas_src>
import functools

import jax
import jax.numpy as jnp
from jax.experimental import pallas as pl
from jax.experimental.pallas import tpu as pltpu


def _layernorm_kernel(x_ref, w_ref, b_ref, o_ref, *, eps):
    # x_ref: (rows_block, D); w_ref / b_ref: (1, D) f32, broadcast over rows.
    x = x_ref[...].astype(jnp.float32)
    mean = jnp.mean(x, axis=-1, keepdims=True)
    xc = x - mean
    # unbiased=False variance (divide by D), matching torch.var(..., unbiased=False).
    var = jnp.mean(xc * xc, axis=-1, keepdims=True)
    inv_std = jax.lax.rsqrt(var + eps)
    y = xc * inv_std
    y = y * w_ref[...] + b_ref[...]
    o_ref[...] = y.astype(o_ref.dtype)


def _round_up(x, m):
    return ((x + m - 1) // m) * m


def _hw_params():
    """Returns (target_block_bytes, vmem_limit_bytes, num_tensorcores_per_chip)."""
    try:
        info = pltpu.get_tpu_info()
        vmem = int(info.vmem_capacity_bytes)
    except Exception:
        # Conservative fallback: small blocks, default-ish limit, assume 2 TCs.
        return 4 * 1024 * 1024, 32 * 1024 * 1024, 2
    if vmem >= 100 * 1024 * 1024:
        # v5e / v6e class: 128 MiB VMEM, single TensorCore per chip.
        return 6 * 1024 * 1024, 64 * 1024 * 1024, 1
    # v7x class: 64 MiB VMEM per TC, 2 TensorCores per chip.
    return 4 * 1024 * 1024, 48 * 1024 * 1024, 2


def _pick_rows_per_block(n_rows, d_model, itemsize, target_block_bytes, num_cores):
    """Choose the row-tile size (second-to-last block dim).

    Goals:
      * bytes-based tile target (~4-6 MiB) to amortize ~0.35 us per-grid-step
        overhead independently of dtype width;
      * rows aligned to the dtype's sublane packing (8/16/32 for 4B/2B/1B);
      * on multi-TC parts, >= 2 pipelined steps per TensorCore when there is
        enough work (megacore sharding + double-buffer overlap per core);
      * on single-TC parts, no forced split (small inputs run as one tile).
    """
    packing = max(1, 4 // itemsize)
    row_align = 8 * packing
    bytes_per_row = d_model * itemsize

    # Bytes-based cap.
    rows = max(row_align, target_block_bytes // bytes_per_row)
    rows = max(row_align, (rows // row_align) * row_align)

    # Never allocate a block bigger than the (row-aligned) input.
    rows = min(rows, _round_up(n_rows, row_align))

    # Megacore: keep >= 2 steps per TensorCore when there is enough work.
    if num_cores > 1:
        min_steps = 2 * num_cores
        if n_rows > min_steps * row_align:
            rows = min(rows, _round_up(pl.cdiv(n_rows, min_steps), row_align))

    return max(row_align, rows)


def layernorm(residual, w, b, *, eps=1e-5, rows_per_block=None):
    """residual: (..., d_model); w, b: (d_model,). Returns same shape/dtype as residual."""
    orig_shape = residual.shape
    d_model = orig_shape[-1]
    x2d = residual.reshape(-1, d_model)
    n_rows = x2d.shape[0]

    target_block_bytes, vmem_limit_bytes, num_cores = _hw_params()

    if rows_per_block is None:
        rows_per_block = _pick_rows_per_block(
            n_rows, d_model, residual.dtype.itemsize, target_block_bytes, num_cores
        )

    # Pre-cast params to f32 once on the host side; they stay resident (constant
    # block index) with no per-step cast work in the kernel.
    w2d = w.reshape(1, d_model).astype(jnp.float32)
    b2d = b.reshape(1, d_model).astype(jnp.float32)

    # d_model is kept as the full (lane) block dim. For d_model % 128 == 0 (e.g.
    # 768) stores are lane-dense; for other configs, pad the lane dim in the
    # wrapper (with masked stats) to avoid masked partial stores.
    grid = (pl.cdiv(n_rows, rows_per_block),)

    out = pl.pallas_call(
        functools.partial(_layernorm_kernel, eps=eps),
        out_shape=jax.ShapeDtypeStruct((n_rows, d_model), residual.dtype),
        grid_spec=pltpu.PrefetchScalarGridSpec(
            num_scalar_prefetch=0,
            grid=grid,
            in_specs=[
                pl.BlockSpec((rows_per_block, d_model), lambda i: (i, 0)),
                pl.BlockSpec((1, d_model), lambda i: (0, 0)),
                pl.BlockSpec((1, d_model), lambda i: (0, 0)),
            ],
            out_specs=pl.BlockSpec((rows_per_block, d_model), lambda i: (i, 0)),
        ),
        compiler_params=pltpu.CompilerParams(
            dimension_semantics=("parallel",),
            vmem_limit_bytes=vmem_limit_bytes,
        ),
    )(x2d, w2d, b2d)

    return out.reshape(orig_shape)


def _reference(residual, w, b, eps):
    mean = residual.mean(axis=-1, keepdims=True)
    var = ((residual - mean) ** 2).mean(axis=-1, keepdims=True)
    return (residual - mean) / jnp.sqrt(var + eps) * w + b


if __name__ == "__main__":
    d_model = 768          # cfg.d_model
    eps = 1e-5             # cfg.layer_norm_eps
    batch, seq = 2, 8      # small shapes

    key = jax.random.PRNGKey(0)
    residual = jax.random.normal(key, (batch, seq, d_model), dtype=jnp.float32)

    # deterministic parameter init matching nn.Parameter(ones/zeros)
    w = jnp.ones((d_model,), dtype=jnp.float32)
    b = jnp.zeros((d_model,), dtype=jnp.float32)

    out = layernorm(residual, w, b, eps=eps)
    jax.block_until_ready(out)
    ref = _reference(residual, w, b, eps)
    assert out.shape == residual.shape and out.dtype == residual.dtype
    assert jnp.allclose(out, ref, atol=1e-5, rtol=1e-5), "mismatch vs reference"

    # Exercise the ragged-last-block, multi-step grid path (masked partial block).
    key2 = jax.random.PRNGKey(0)
    residual2 = jax.random.normal(key2, (13, d_model), dtype=jnp.float32)
    out2 = layernorm(residual2, w, b, eps=eps, rows_per_block=8)
    jax.block_until_ready(out2)
    ref2 = _reference(residual2, w, b, eps)
    assert jnp.allclose(out2, ref2, atol=1e-5, rtol=1e-5), "mismatch on ragged rows"

    # Exercise the bf16 path (bytes-based tile cap + f32 upcast inside the kernel).
    residual3 = jax.random.normal(key, (4, seq, d_model), dtype=jnp.bfloat16)
    out3 = layernorm(residual3, w, b, eps=eps)
    jax.block_until_ready(out3)
    ref3 = _reference(residual3.astype(jnp.float32), w, b, eps).astype(jnp.bfloat16)
    assert out3.dtype == jnp.bfloat16
    assert jnp.allclose(out3.astype(jnp.float32), ref3.astype(jnp.float32),
                        atol=2e-2, rtol=2e-2), "mismatch on bf16 path"

    print("KERNEL_OK")
</pallas_src>

<mosaic_0001>
module attributes {stable_mosaic.version = 11 : i64} {
  func.func @_layernorm_kernel(%arg0: i32, %arg1: memref<16x768xf32, #tpu.memory_space<vmem>>, %arg2: memref<1x768xf32, #tpu.memory_space<vmem>>, %arg3: memref<1x768xf32, #tpu.memory_space<vmem>>, %arg4: memref<16x768xf32, #tpu.memory_space<vmem>>) attributes {dimension_semantics = [#tpu.dimension_semantics<parallel>], iteration_bounds = array<i64: 1>, scalar_prefetch = 0 : i64, scratch_operands = 0 : i64, tpu.core_type = #tpu.core_type<tc>, window_params = [{transform_indices = @transform_0, window_bounds = array<i64: 16, 768>}, {pipeline_mode = #tpu.pipeline_mode<synchronous>, transform_indices = @transform_1, window_bounds = array<i64: 1, 768>}, {pipeline_mode = #tpu.pipeline_mode<synchronous>, transform_indices = @transform_2, window_bounds = array<i64: 1, 768>}, {transform_indices = @transform_3, window_bounds = array<i64: 16, 768>}]} {
    %c0 = arith.constant 0 : index
    %c0_0 = arith.constant 0 : index
    %0 = vector.load %arg1[%c0, %c0_0] : memref<16x768xf32, #tpu.memory_space<vmem>>, vector<16x768xf32>
    %cst = arith.constant dense<0.000000e+00> : vector<16xf32>
    %1 = vector.multi_reduction <add>, %0, %cst [1] : vector<16x768xf32> to vector<16xf32>
    %2 = vector.shape_cast %1 : vector<16xf32> to vector<16x1xf32>
    %cst_1 = arith.constant 7.680000e+02 : f32
    %3 = vector.broadcast %cst_1 : f32 to vector<16x1xf32>
    %4 = arith.divf %2, %3 : vector<16x1xf32>
    %5 = vector.broadcast %4 : vector<16x1xf32> to vector<16x768xf32>
    %6 = arith.subf %0, %5 : vector<16x768xf32>
    %7 = arith.mulf %6, %6 : vector<16x768xf32>
    %cst_2 = arith.constant dense<0.000000e+00> : vector<16xf32>
    %8 = vector.multi_reduction <add>, %7, %cst_2 [1] : vector<16x768xf32> to vector<16xf32>
    %9 = vector.shape_cast %8 : vector<16xf32> to vector<16x1xf32>
    %cst_3 = arith.constant 7.680000e+02 : f32
    %10 = vector.broadcast %cst_3 : f32 to vector<16x1xf32>
    %11 = arith.divf %9, %10 : vector<16x1xf32>
    %cst_4 = arith.constant 9.99999974E-6 : f32
    %12 = vector.broadcast %cst_4 : f32 to vector<16x1xf32>
    %13 = arith.addf %11, %12 : vector<16x1xf32>
    %14 = math.rsqrt %13 : vector<16x1xf32>
    %15 = vector.broadcast %14 : vector<16x1xf32> to vector<16x768xf32>
    %16 = arith.mulf %6, %15 : vector<16x768xf32>
    %c0_5 = arith.constant 0 : index
    %c0_6 = arith.constant 0 : index
    %17 = vector.load %arg2[%c0_5, %c0_6] : memref<1x768xf32, #tpu.memory_space<vmem>>, vector<1x768xf32>
    %18 = vector.broadcast %17 : vector<1x768xf32> to vector<16x768xf32>
    %19 = arith.mulf %16, %18 : vector<16x768xf32>
    %c0_7 = arith.constant 0 : index
    %c0_8 = arith.constant 0 : index
    %20 = vector.load %arg3[%c0_7, %c0_8] : memref<1x768xf32, #tpu.memory_space<vmem>>, vector<1x768xf32>
    %21 = vector.broadcast %20 : vector<1x768xf32> to vector<16x768xf32>
    %22 = arith.addf %19, %21 : vector<16x768xf32>
    %c0_9 = arith.constant 0 : index
    %c0_10 = arith.constant 0 : index
    %23 = vector.load %arg4[%c0_9, %c0_10] : memref<16x768xf32, #tpu.memory_space<vmem>>, vector<16x768xf32>
    tpu.vector_store %arg4[%c0_9, %c0_10], %22 {strides = array<i32>} : memref<16x768xf32, #tpu.memory_space<vmem>>, vector<16x768xf32>,
    return
  }
  func.func @transform_0(%arg0: i32) -> (i32, i32) {
    %c0_i32 = arith.constant 0 : i32
    %c0_i32_0 = arith.constant 0 : i32
    return %arg0, %c0_i32 : i32, i32
  }
  func.func @transform_1(%arg0: i32) -> (i32, i32) {
    %c0_i32 = arith.constant 0 : i32
    %c0_i32_0 = arith.constant 0 : i32
    %c0_i32_1 = arith.constant 0 : i32
    return %c0_i32, %c0_i32_0 : i32, i32
  }
  func.func @transform_2(%arg0: i32) -> (i32, i32) {
    %c0_i32 = arith.constant 0 : i32
    %c0_i32_0 = arith.constant 0 : i32
    %c0_i32_1 = arith.constant 0 : i32
    return %c0_i32, %c0_i32_0 : i32, i32
  }
  func.func @transform_3(%arg0: i32) -> (i32, i32) {
    %c0_i32 = arith.constant 0 : i32
    %c0_i32_0 = arith.constant 0 : i32
    return %arg0, %c0_i32 : i32, i32
  }
}

</mosaic_0001>

<bundles_post_ra>
// kernel: tpu_custom_call.1
= control target key start
LH: loop header
LB: loop body
LE: loop exit
PB: predicated region body
PF: predicated region fallthrough
CT: control target
= control target key end

     0   :  { %8 = vsyncpa [#allocation3], 0  ;;  %s440_s0 = inlined_call_operand.hbm [shape: f32[16,768], index: 0, kind: input, shape index: {}]   ;;  %s441_s1 = inlined_call_operand.hbm [shape: f32[1,768], index: 1, kind: input, shape index: {}]   ;;  %s442_s2 = inlined_call_operand.hbm [shape: f32[1,768], index: 2, kind: input, shape index: {}]   ;;  %s443_s3 = inlined_call_operand.hbm [shape: f32[16,768], index: 3, kind: output, shape index: {}]  }
   0x1   :  { %9 = vsyncpa [#allocation6], 0 }
   0x2   :  { %10 = vsyncpa [#allocation4], 0  ;;  %s351_s12 = smov [#allocation5]   ;;  %s352_s14 = smov [#allocation2]  }
   0x3   :  { %s29_s13 = sshll.u32 %s351_s12, 4  ;;  %s16_s15 = sshll.u32 %s352_s14, 4  ;;  %s30_s13 = int_to_ptr.vmem [resolvable:$true] %s29_s13  ;;  %s17_s15 = int_to_ptr.vmem [resolvable:$true] %s16_s15 }
   0x4   :  { %s273_s16 = scalar_lea.vmem %s30_s13, 96  ;;  %p278_p1 = scmp.lt.s32.totalorder %s30_s13, %s30_s13 }
   0x5   :  { %p274_p0 = scmp.ne.s32.totalorder %s30_s13, %s273_s16  ;;  %p279_p2 = scmp.lt.s32.totalorder %s273_s16, %s273_s16 }
   0x7   :  { %p280_p3 = por %p279_p2, %p278_p1 }
   0x9   :  { %p281_p4 = pnand %p280_p3, %p274_p0 }
   0xb   :  { %284 = shalt.err (!%p281_p4)
}
   0xc   :  { %32 = dma.hbm_to_vmem [thread:$0]  %s441_s1, 96, %s30_s13, [#allocation6]  }
   0xd   :  { %s293_s19 = scalar_lea.vmem %s17_s15, 1536  ;;  %p298_p6 = scmp.lt.s32.totalorder %s17_s15, %s17_s15 }
   0xe   :  { %p294_p5 = scmp.ne.s32.totalorder %s17_s15, %s293_s19  ;;  %p299_p7 = scmp.lt.s32.totalorder %s293_s19, %s293_s19 }
  0x10   :  { %p300_p8 = por %p299_p7, %p298_p6 }
  0x12   :  { %p301_p9 = pnand %p300_p8, %p294_p5 }
  0x14   :  { %304 = shalt.err (!%p301_p9)
}
  0x15   :  { %s353_s20 = smov 768   ;;  %s354_s21 = smov 48  }
  0x16   :  { %22 = dma.hbm_to_vmem [thread:$0]  %s440_s0, 1536, %s17_s15, [#allocation3], %s353_s20, %s353_s20, %s354_s21  }
  0x17   :  { %s355_s24 = smov [#allocation7]  }
  0x18   :  { %s39_s25 = sshll.u32 %s355_s24, 4  ;;  %s40_s25 = int_to_ptr.vmem [resolvable:$true] %s39_s25 }
  0x19   :  { %s313_s1 = scalar_lea.vmem %s40_s25, 96  ;;  %p318_p11 = scmp.lt.s32.totalorder %s40_s25, %s40_s25 }
  0x1a   :  { %p314_p10 = scmp.ne.s32.totalorder %s40_s25, %s313_s1  ;;  %p319_p12 = scmp.lt.s32.totalorder %s313_s1, %s313_s1 }
  0x1c   :  { %p320_p13 = por %p319_p12, %p318_p11 }
  0x1e   :  { %p321_p0 = pnand %p320_p13, %p314_p10 }
  0x20   :  { %324 = shalt.err (!%p321_p0)
}
  0x21   :  { %42 = dma.hbm_to_vmem [thread:$0]  %s442_s2, 96, %s40_s25, [#allocation6]  }
  0x22   :  { %345 = dma.done.wait [#allocation3], 1536  }
  0x23   :  { %346 = vsyncadd [#allocation3], 4294965760 }
  0x24   :  { %347 = dma.done.wait [#allocation6], 192  }
  0x25   :  { %348 = vsyncadd [#allocation6], 4294967104  ;;  %v52_v0 = vld [vmem:[#allocation2] sm:$0xff]  ;;  %v53_v1 = vld [vmem:[#allocation2 + $0x8] sm:$0xff]  ;;  %s356_s0 = smov [#allocation8]  }
  0x26   :  { %v54_v2 = vld [vmem:[#allocation2 + $0x10] sm:$0xff]  ;;  %v55_v3 = vld [vmem:[#allocation2 + $0x18] sm:$0xff]  ;;  %v64_v4 = vadd.f32 %v53_v1, %v52_v0  ;;  %v60_v7 = vld [vmem:[#allocation2 + $0x40] sm:$0xff]  ;;  %s242_s2 = sshll.u32 %s356_s0, 4  ;;  %s243_s2 = int_to_ptr.vmem [resolvable:$true] %s242_s2 }
  0x27   :  { %v58_v5 = vld [vmem:[#allocation2 + $0x30] sm:$0xff]  ;;  %v59_v6 = vld [vmem:[#allocation2 + $0x38] sm:$0xff]  ;;  %v56_v10 = vld [vmem:[#allocation2 + $0x20] sm:$0xff]  ;;  %s325_s28 = scalar_lea.vmem %s243_s2, 1536  ;;  %p330_p2 = scmp.lt.s32.totalorder %s243_s2, %s243_s2 }
  0x28   :  { %v65_v8 = vadd.f32 %v64_v4, %v54_v2  ;;  %v71_v9 = vadd.f32 %v59_v6, %v58_v5  ;;  %v61_v11 = vld [vmem:[#allocation2 + $0x48] sm:$0xff]  ;;  %v62_v15 = vld [vmem:[#allocation2 + $0x50] sm:$0xff]  ;;  %v63_v18 = vld [vmem:[#allocation2 + $0x58] sm:$0xff]  ;;  %p326_p1 = scmp.ne.s32.totalorder %s243_s2, %s325_s28  ;;  %p331_p3 = scmp.lt.s32.totalorder %s325_s28, %s325_s28 }
  0x29   :  { %v57_v14 = vld [vmem:[#allocation2 + $0x28] sm:$0xff] }
  0x2a   :  { %v66_v12 = vadd.f32 %v65_v8, %v55_v3  ;;  %v72_v13 = vadd.f32 %v71_v9, %v60_v7  ;;  %v137_v8 = vld [vmem:[#allocation5] sm:$0x3f]  ;;  %p332_p4 = por %p331_p3, %p330_p2 }
  0x2c   :  { %v67_v16 = vadd.f32 %v66_v12, %v56_v10  ;;  %v73_v17 = vadd.f32 %v72_v13, %v61_v11  ;;  %p333_p5 = pnand %p332_p4, %p326_p1 }
  0x2e   :  { %v68_v19 = vadd.f32 %v67_v16, %v57_v14  ;;  %v74_v20 = vadd.f32 %v73_v17, %v62_v15 }
  0x30   :  { %69 = vadd.xlane.f32.xlu0 %v68_v19  ;;  %v75_v21 = vadd.f32 %v74_v20, %v63_v18 }
  0x34   :  { %76 = vadd.xlane.f32.xlu0 %v75_v21 }
  0xb9   :  { %v70_v22 = vpop.xlane.xlu0 %69 }
  0xba   :  { %v79_v23 = vmul.f32 0.0013020834, %v70_v22 }
  0xbc   :  { %v389_v24 = vsub.f32 %v52_v0, %v79_v23  ;;  %v391_v25 = vsub.f32 %v53_v1, %v79_v23  ;;  %v393_v26 = vsub.f32 %v54_v2, %v79_v23  ;;  %v395_v28 = vsub.f32 %v55_v3, %v79_v23 }
  0xbd   :  { %v77_v27 = vpop.xlane.xlu0 %76  ;;  %v85_v32 = vsub.f32 %v56_v10, %v79_v23  ;;  %v86_v38 = vsub.f32 %v57_v14, %v79_v23  ;;  %v139_v1 = vlaneseq }
  0xbe   :  { %v80_v29 = vmul.f32 0.0013020834, %v77_v27  ;;  %v93_v30 = vmul.f32 %v389_v24, %v389_v24  ;;  %v94_v31 = vmul.f32 %v391_v25, %v391_v25  ;;  %v95_v33 = vmul.f32 %v393_v26, %v393_v26 }
  0xbf   :  { %v96_v39 = vmul.f32 %v395_v28, %v395_v28  ;;  %v97_v44 = vmul.f32 %v85_v32, %v85_v32  ;;  %v98_v49 = vmul.f32 %v86_v38, %v86_v38  ;;  %v140_v3 = vshrl.u32 %v139_v1, 7 }
  0xc0   :  { %v105_v34 = vadd.f32 %v94_v31, %v93_v30  ;;  %v403_v35 = vsub.f32 %v58_v5, %v80_v29  ;;  %v405_v36 = vsub.f32 %v59_v6, %v80_v29  ;;  %v407_v37 = vsub.f32 %v60_v7, %v80_v29 }
  0xc1   :  { %v411_v41 = vsub.f32 %v61_v11, %v80_v29  ;;  %v417_v46 = vsub.f32 %v62_v15, %v80_v29  ;;  %v92_v51 = vsub.f32 %v63_v18, %v80_v29  ;;  %v141_v4 = vsub.s32 0, %v140_v3  ;;  %v181_v11 = vld [vmem:[#allocation7] sm:$0x3f] }
  0xc2   :  { %v106_v40 = vadd.f32 %v105_v34, %v95_v33  ;;  %v99_v42 = vmul.f32 %v403_v35, %v403_v35  ;;  %v100_v43 = vmul.f32 %v405_v36, %v405_v36  ;;  %v101_v47 = vmul.f32 %v407_v37, %v407_v37 }
  0xc3   :  { %v102_v52 = vmul.f32 %v411_v41, %v411_v41  ;;  %v103_v55 = vmul.f32 %v417_v46, %v417_v46  ;;  %v104_v57 = vmul.f32 %v92_v51, %v92_v51  ;;  %v145_v5 = vsub.s32 1, %v140_v3 }
  0xc4   :  { %v107_v45 = vadd.f32 %v106_v40, %v96_v39  ;;  %v112_v48 = vadd.f32 %v100_v43, %v99_v42  ;;  %v149_v6 = vsub.s32 2, %v140_v3  ;;  %v153_v7 = vsub.s32 3, %v140_v3 }
  0xc5   :  { %v157_v9 = vsub.s32 4, %v140_v3  ;;  %v161_v10 = vsub.s32 5, %v140_v3  ;;  %v142_v12 = vrot.slane %v137_v8, %v141_v4  ;;  %v146_v13 = vrot.slane %v137_v8, %v145_v5 }
  0xc6   :  { %v108_v50 = vadd.f32 %v107_v45, %v97_v44  ;;  %v113_v53 = vadd.f32 %v112_v48, %v101_v47  ;;  %v150_v14 = vrot.slane %v137_v8, %v149_v6  ;;  %v154_v15 = vrot.slane %v137_v8, %v153_v7 }
  0xc7   :  { %v158_v17 = vrot.slane %v137_v8, %v157_v9  ;;  %v162_v18 = vrot.slane %v137_v8, %v161_v10  ;;  %v186_v19 = vrot.slane %v181_v11, %v141_v4  ;;  %v190_v20 = vrot.slane %v181_v11, %v145_v5 }
  0xc8   :  { %v109_v54 = vadd.f32 %v108_v50, %v98_v49  ;;  %v114_v56 = vadd.f32 %v113_v53, %v102_v52  ;;  %v194_v31 = vrot.slane %v181_v11, %v149_v6  ;;  %v198_v33 = vrot.slane %v181_v11, %v153_v7 }
  0xc9   :  { %v202_v40 = vrot.slane %v181_v11, %v157_v9  ;;  %v206_v42 = vrot.slane %v181_v11, %v161_v10 }
  0xca   :  { %110 = vadd.xlane.f32.xlu1 %v109_v54  ;;  %v115_v58 = vadd.f32 %v114_v56, %v103_v55 }
  0xcc   :  { %v116_v59 = vadd.f32 %v115_v58, %v104_v57 }
  0xce   :  { %117 = vadd.xlane.f32.xlu1 %v116_v59 }
 0x153   :  { %v111_v60 = vpop.xlane.xlu1 %110 }
 0x154   :  { %v119_v61 = vmul.f32 0.0013020834, %v111_v60 }
 0x156   :  { %v121_v62 = vadd.f32 1e-05, %v119_v61 }
 0x157   :  { %v118_v63 = vpop.xlane.xlu1 %117 }
 0x158   :  { %261 = vrsqrt.f32 %v121_v62  ;;  %v120_v0 = vmul.f32 0.0013020834, %v118_v63 }
 0x15a   :  { %v122_v2 = vadd.f32 1e-05, %v120_v0 }
 0x15c   :  { %263 = vrsqrt.f32 %v122_v2 }
 0x165   :  { %v262_v16 = vpop.eup %261 }
 0x166   :  { %v125_v21 = vmul.f32 %v262_v16, %v389_v24  ;;  %v126_v22 = vmul.f32 %v262_v16, %v391_v25  ;;  %v127_v23 = vmul.f32 %v262_v16, %v393_v26  ;;  %v128_v27 = vmul.f32 %v262_v16, %v395_v28 }
 0x167   :  { %v129_v29 = vmul.f32 %v262_v16, %v85_v32  ;;  %v130_v30 = vmul.f32 %v262_v16, %v86_v38 }
 0x168   :  { %v169_v34 = vmul.f32 %v142_v12, %v125_v21  ;;  %v170_v39 = vmul.f32 %v146_v13, %v126_v22  ;;  %v171_v44 = vmul.f32 %v150_v14, %v127_v23  ;;  %v172_v45 = vmul.f32 %v154_v15, %v128_v27 }
 0x169   :  { %v264_v43 = vpop.eup %263  ;;  %v173_v47 = vmul.f32 %v158_v17, %v129_v29  ;;  %v174_v48 = vmul.f32 %v162_v18, %v130_v30 }
 0x16a   :  { %v131_v24 = vmul.f32 %v264_v43, %v403_v35  ;;  %v132_v25 = vmul.f32 %v264_v43, %v405_v36  ;;  %v133_v26 = vmul.f32 %v264_v43, %v407_v37  ;;  %v134_v28 = vmul.f32 %v264_v43, %v411_v41 }
 0x16b   :  { %v135_v32 = vmul.f32 %v264_v43, %v417_v46  ;;  %v136_v38 = vmul.f32 %v264_v43, %v92_v51  ;;  %v213_v49 = vadd.f32 %v186_v19, %v169_v34  ;;  %v214_v50 = vadd.f32 %v190_v20, %v170_v39 }
 0x16c   :  { %v175_v52 = vmul.f32 %v142_v12, %v131_v24  ;;  %v176_v53 = vmul.f32 %v146_v13, %v132_v25  ;;  %v177_v54 = vmul.f32 %v150_v14, %v133_v26  ;;  %v178_v55 = vmul.f32 %v154_v15, %v134_v28 }
 0x16d   :  { %v179_v56 = vmul.f32 %v158_v17, %v135_v32  ;;  %v180_v57 = vmul.f32 %v162_v18, %v136_v38  ;;  %v215_v35 = vadd.f32 %v194_v31, %v171_v44  ;;  %v216_v58 = vadd.f32 %v198_v33, %v172_v45  ;;  %225 = vst [vmem:[#allocation8] sm:$0xff] %v213_v49 }
 0x16e   :  { %226 = vst [vmem:[#allocation8 + $0x8] sm:$0xff] %v214_v50  ;;  %v217_v36 = vadd.f32 %v202_v40, %v173_v47  ;;  %v218_v37 = vadd.f32 %v206_v42, %v174_v48  ;;  %v219_v41 = vadd.f32 %v186_v19, %v175_v52  ;;  %v220_v59 = vadd.f32 %v190_v20, %v176_v53 }
 0x16f   :  { %v221_v46 = vadd.f32 %v194_v31, %v177_v54  ;;  %v222_v51 = vadd.f32 %v198_v33, %v178_v55  ;;  %v223_v60 = vadd.f32 %v202_v40, %v179_v56  ;;  %v224_v61 = vadd.f32 %v206_v42, %v180_v57  ;;  %227 = vst [vmem:[#allocation8 + $0x10] sm:$0xff] %v215_v35 }
 0x170   :  { %228 = vst [vmem:[#allocation8 + $0x18] sm:$0xff] %v216_v58  ;;  %229 = vst [vmem:[#allocation8 + $0x20] sm:$0xff] %v217_v36 }
 0x171   :  { %230 = vst [vmem:[#allocation8 + $0x28] sm:$0xff] %v218_v37  ;;  %231 = vst [vmem:[#allocation8 + $0x30] sm:$0xff] %v219_v41 }
 0x172   :  { %232 = vst [vmem:[#allocation8 + $0x38] sm:$0xff] %v220_v59  ;;  %233 = vst [vmem:[#allocation8 + $0x40] sm:$0xff] %v221_v46 }
 0x173   :  { %234 = vst [vmem:[#allocation8 + $0x48] sm:$0xff] %v222_v51  ;;  %235 = vst [vmem:[#allocation8 + $0x50] sm:$0xff] %v223_v60 }
 0x174   :  { %236 = vst [vmem:[#allocation8 + $0x58] sm:$0xff] %v224_v61 }
 0x175   :  { %336 = shalt.err (!%p333_p5)
}
 0x176   :  { %248 = dma.vmem_to_hbm [thread:$0]  %s243_s2, 1536, %s443_s3, [#allocation4], %s353_s20, %s353_s20, %s354_s21  }
 0x177   :  { %349 = dma.done.wait [#allocation4], 1536  }
 0x178   :  { %350 = vsyncadd [#allocation4], 4294965760 }
 0x179   :  { %252 = vsyncpa [#allocation3], 1 }
 0x17a   :  { %253 = vsyncpa [#allocation6], 1 }
 0x17b   :  { %254 = vsyncpa [#allocation4], 1 }

</bundles_post_ra>
